<compile_context>
chip_gen: v6e
topology: v6e:2x2x1
jax: 0.10.0
libtpu: 0.0.40
codegen_flags: <defaults>
</compile_context>

<pallas_src>
import jax
import jax.numpy as jnp
from jax.experimental import pallas as pl
from jax.experimental.pallas import tpu as pltpu


# ---------------------------------------------------------------------------
# One-shot weight normalization kernel (runs once, outside the main grid).
# F.normalize(W) with W of shape (in_features, out_features): L2 over the last
# axis, denom clamped at 1e-12.  Output cast to bf16 for the MXU.
# ---------------------------------------------------------------------------
def _normalize_weight_kernel(w_ref, o_ref):
    w = w_ref[...].astype(jnp.float32)
    denom = jnp.maximum(
        jnp.sqrt(jnp.sum(w * w, axis=-1, keepdims=True)), 1e-12)
    o_ref[...] = (w * pl.reciprocal(denom, approx=True)).astype(o_ref.dtype)


def normalize_weight(weight, *, block_r=512, out_dtype=jnp.bfloat16):
    in_f, out_f = weight.shape
    # Reduction is over the full last axis, so tile only the row (in_f) axis.
    block_r = in_f if in_f <= block_r else (block_r // 8) * 8
    grid = (pl.cdiv(in_f, block_r),)
    return pl.pallas_call(
        _normalize_weight_kernel,
        out_shape=jax.ShapeDtypeStruct((in_f, out_f), out_dtype),
        grid=grid,
        in_specs=[pl.BlockSpec((block_r, out_f), lambda i: (i, 0))],
        out_specs=pl.BlockSpec((block_r, out_f), lambda i: (i, 0)),
        compiler_params=pltpu.CompilerParams(
            dimension_semantics=("parallel",)),
    )(weight)


# ---------------------------------------------------------------------------
# Main kernel: fused (LayerNorm -> L2-normalize -> matmul -> /temperature).
# ---------------------------------------------------------------------------
def norm_softmax_kernel(temp_ref, x_ref, wn_ref, o_ref):
    x = x_ref[...].astype(jnp.float32)

    # LayerNorm(no affine) followed by F.normalize collapses algebraically to
    #   x_n = (x - mean) / max(||x - mean||_2, 1e-12)
    # (rsqrt(var + eps) cancels in the ratio x_ln / ||x_ln||).
    mean = jnp.mean(x, axis=-1, keepdims=True)
    xc = x - mean
    denom = jnp.maximum(
        jnp.sqrt(jnp.sum(xc * xc, axis=-1, keepdims=True)), 1e-12)

    # Fold the temperature into the per-row scale (one scalar per row) instead
    # of dividing the (block_b, out_f) output tile.
    inv = pl.reciprocal(denom * temp_ref[0], approx=True)
    x_n = (xc * inv).astype(wn_ref.dtype)          # bf16 operand for the MXU

    out = jnp.dot(x_n, wn_ref[...], preferred_element_type=jnp.float32)
    o_ref[...] = out.astype(o_ref.dtype)


def norm_softmax(x, weight, temperature, *, block_b=256, block_n=512):
    B, in_f = x.shape
    in_f_w, out_f = weight.shape
    assert in_f == in_f_w

    # Hoisted, one-shot: L2-normalize W (over out_features) + cast to bf16.
    w_n = normalize_weight(weight)

    # Tile sizes: full dim if small, otherwise sublane/lane aligned.
    block_b = B if B <= block_b else max(8, (block_b // 8) * 8)
    block_n = out_f if out_f <= block_n else max(128, (block_n // 128) * 128)

    grid = (pl.cdiv(B, block_b), pl.cdiv(out_f, block_n))
    return pl.pallas_call(
        norm_softmax_kernel,
        out_shape=jax.ShapeDtypeStruct((B, out_f), x.dtype),
        grid=grid,
        in_specs=[
            pl.BlockSpec(memory_space=pltpu.SMEM),                  # temperature (1,)
            pl.BlockSpec((block_b, in_f), lambda i, j: (i, 0)),     # x row tile
            pl.BlockSpec((in_f, block_n), lambda i, j: (0, j)),     # normalized W col tile
        ],
        out_specs=pl.BlockSpec((block_b, block_n), lambda i, j: (i, j)),
        compiler_params=pltpu.CompilerParams(
            dimension_semantics=("parallel", "parallel")),
    )(temperature, x, w_n)


# ---------------------------------------------------------------------------
# Pure-JAX reference mirroring the PyTorch forward exactly (f32 throughout).
# ---------------------------------------------------------------------------
def norm_softmax_ref(x, weight, temperature):
    mean = jnp.mean(x, axis=-1, keepdims=True)
    var = jnp.mean((x - mean) ** 2, axis=-1, keepdims=True)
    x_ln = (x - mean) / jnp.sqrt(var + 1e-5)
    x_n = x_ln / jnp.maximum(
        jnp.linalg.norm(x_ln, axis=-1, keepdims=True), 1e-12)
    w_n = weight / jnp.maximum(
        jnp.linalg.norm(weight, axis=-1, keepdims=True), 1e-12)
    return (x_n @ w_n) / temperature[0]


if __name__ == "__main__":
    # Small but tile-friendly shapes: out_features multiple of 128 (lane-dense
    # output stores), batch a multiple of 8 (sublane-aligned row tiles).
    batch, in_features, out_features = 64, 128, 256
    temperature_init = 1.0

    key = jax.random.PRNGKey(0)
    kx, kw = jax.random.split(key)

    x = jax.random.normal(kx, (batch, in_features), dtype=jnp.float32)

    # xavier_uniform_ on weight of shape (in_features, out_features)
    bound = (6.0 / (in_features + out_features)) ** 0.5
    weight = jax.random.uniform(
        kw, (in_features, out_features), dtype=jnp.float32,
        minval=-bound, maxval=bound)

    temperature = jnp.array([temperature_init], dtype=jnp.float32)

    out = norm_softmax(x, weight, temperature)
    out = jax.block_until_ready(out)

    ref = norm_softmax_ref(x, weight, temperature)
    assert out.shape == (batch, out_features)
    # Relaxed tolerance: matmul operands are bf16 (f32 accumulation) and the
    # row/weight reciprocals use the approximate EUP path.
    assert jnp.allclose(out, ref, atol=1e-2, rtol=1e-2), (
        float(jnp.max(jnp.abs(out - ref))))

    print("KERNEL_OK")
</pallas_src>

<mosaic_0001>
module attributes {stable_mosaic.version = 11 : i64} {
  func.func @_normalize_weight_kernel(%arg0: i32, %arg1: memref<128x256xf32, #tpu.memory_space<vmem>>, %arg2: memref<128x256xbf16, #tpu.memory_space<vmem>>) attributes {dimension_semantics = [#tpu.dimension_semantics<parallel>], iteration_bounds = array<i64: 1>, scalar_prefetch = 0 : i64, scratch_operands = 0 : i64, tpu.core_type = #tpu.core_type<tc>, window_params = [{transform_indices = @transform_0, window_bounds = array<i64: 128, 256>}, {transform_indices = @transform_1, window_bounds = array<i64: 128, 256>}]} {
    %c0 = arith.constant 0 : index
    %c0_0 = arith.constant 0 : index
    %0 = vector.load %arg1[%c0, %c0_0] : memref<128x256xf32, #tpu.memory_space<vmem>>, vector<128x256xf32>
    %1 = arith.mulf %0, %0 : vector<128x256xf32>
    %cst = arith.constant dense<0.000000e+00> : vector<128xf32>
    %2 = vector.multi_reduction <add>, %1, %cst [1] : vector<128x256xf32> to vector<128xf32>
    %3 = vector.shape_cast %2 : vector<128xf32> to vector<128x1xf32>
    %4 = math.sqrt %3 : vector<128x1xf32>
    %cst_1 = arith.constant 9.99999996E-13 : f32
    %5 = vector.broadcast %cst_1 : f32 to vector<128x1xf32>
    %6 = arith.maximumf %4, %5 : vector<128x1xf32>
    %7 = tpu.reciprocal %6 {approx = true} : vector<128x1xf32> -> vector<128x1xf32>
    %8 = vector.broadcast %7 : vector<128x1xf32> to vector<128x256xf32>
    %9 = arith.mulf %0, %8 : vector<128x256xf32>
    %10 = arith.truncf %9 : vector<128x256xf32> to vector<128x256xbf16>
    %c0_2 = arith.constant 0 : index
    %c0_3 = arith.constant 0 : index
    %11 = vector.load %arg2[%c0_2, %c0_3] : memref<128x256xbf16, #tpu.memory_space<vmem>>, vector<128x256xbf16>
    tpu.vector_store %arg2[%c0_2, %c0_3], %10 {strides = array<i32>} : memref<128x256xbf16, #tpu.memory_space<vmem>>, vector<128x256xbf16>,
    return
  }
  func.func @transform_0(%arg0: i32) -> (i32, i32) {
    %c0_i32 = arith.constant 0 : i32
    %c0_i32_0 = arith.constant 0 : i32
    return %arg0, %c0_i32 : i32, i32
  }
  func.func @transform_1(%arg0: i32) -> (i32, i32) {
    %c0_i32 = arith.constant 0 : i32
    %c0_i32_0 = arith.constant 0 : i32
    return %arg0, %c0_i32 : i32, i32
  }
}

</mosaic_0001>

<bundles_post_ra>
// kernel: tpu_custom_call.1
= control target key start
LH: loop header
LB: loop body
LE: loop exit
PB: predicated region body
PF: predicated region fallthrough
CT: control target
= control target key end

     0   :  { %6 = vsyncpa [#allocation3], 0  ;;  %s918_s0 = inlined_call_operand.hbm [shape: f32[128,256], index: 0, kind: input, shape index: {}]   ;;  %s919_s1 = inlined_call_operand.hbm [shape: bf16[128,256], index: 1, kind: output, shape index: {}]  }
   0x1   :  { %7 = vsyncpa [#allocation4], 0  ;;  %s586_s6 = smov [#allocation2]  }
   0x2   :  { %s13_s7 = sshll.u32 %s586_s6, 4  ;;  %s14_s7 = int_to_ptr.vmem [resolvable:$true] %s13_s7 }
   0x3   :  { %s550_s8 = scalar_lea.vmem %s14_s7, 4096  ;;  %p555_p1 = scmp.lt.s32.totalorder %s14_s7, %s14_s7 }
   0x4   :  { %p551_p0 = scmp.ne.s32.totalorder %s14_s7, %s550_s8  ;;  %p556_p2 = scmp.lt.s32.totalorder %s550_s8, %s550_s8 }
   0x6   :  { %p557_p3 = por %p556_p2, %p555_p1 }
   0x8   :  { %p558_p4 = pnand %p557_p3, %p551_p0 }
   0xa   :  { %561 = shalt.err (!%p558_p4)
}
   0xb   :  { %s587_s9 = smov 256   ;;  %s588_s10 = smov 16  }
   0xc   :  { %19 = dma.hbm_to_vmem [thread:$0]  %s918_s0, 4096, %s14_s7, [#allocation3], %s587_s9, %s587_s9, %s588_s10  }
   0xd   :  { %582 = dma.done.wait [#allocation3], 4096  }
   0xe   :  { %583 = vsyncadd [#allocation3], 4294963200  ;;  %v605_v0 = vld [vmem:[#allocation2 + $0x20] sm:$0xff]  ;;  %v607_v1 = vld [vmem:[#allocation2 + $0x28] sm:$0xff]  ;;  %s589_s0 = smov [#allocation5]  }
   0xf   :  { %v609_v2 = vld [vmem:[#allocation2] sm:$0xff]  ;;  %v59_v3 = vmul.f32 %v605_v0, %v605_v0  ;;  %v60_v4 = vmul.f32 %v607_v1, %v607_v1  ;;  %v615_v5 = vld [vmem:[#allocation2 + $0x8] sm:$0xff]  ;;  %v619_v7 = vld [vmem:[#allocation2 + $0x30] sm:$0xff]  ;;  %s428_s13 = sshll.u32 %s589_s0, 4  ;;  %s429_s13 = int_to_ptr.vmem [resolvable:$true] %s428_s13 }
  0x10   :  { %v55_v6 = vmul.f32 %v609_v2, %v609_v2  ;;  %v621_v8 = vld [vmem:[#allocation2 + $0x38] sm:$0xff]  ;;  %v56_v9 = vmul.f32 %v615_v5, %v615_v5  ;;  %v61_v10 = vmul.f32 %v619_v7, %v619_v7  ;;  %v629_v12 = vld [vmem:[#allocation2 + $0x10] sm:$0xff]  ;;  %v641_v19 = vld [vmem:[#allocation2 + $0x40] sm:$0xff]  ;;  %s562_s14 = scalar_lea.vmem %s429_s13, 2048  ;;  %p567_p6 = scmp.lt.s32.totalorder %s429_s13, %s429_s13 }
  0x11   :  { %v62_v11 = vmul.f32 %v621_v8, %v621_v8  ;;  %v631_v13 = vld [vmem:[#allocation2 + $0x18] sm:$0xff]  ;;  %v633_v14 = vld [vmem:[#allocation2 + $0x50] sm:$0xff]  ;;  %v93_v15 = vadd.f32 %v60_v4, %v59_v3  ;;  %v57_v16 = vmul.f32 %v629_v12, %v629_v12  ;;  %v643_v20 = vld [vmem:[#allocation2 + $0x48] sm:$0xff]  ;;  %v63_v26 = vmul.f32 %v641_v19, %v641_v19  ;;  %p563_p5 = scmp.ne.s32.totalorder %s429_s13, %s562_s14  ;;  %p568_p7 = scmp.lt.s32.totalorder %s562_s14, %s562_s14 }
  0x12   :  { %v58_v17 = vmul.f32 %v631_v13, %v631_v13  ;;  %v639_v18 = vld [vmem:[#allocation2 + $0x58] sm:$0xff]  ;;  %v87_v21 = vadd.f32 %v56_v9, %v55_v6  ;;  %v65_v23 = vmul.f32 %v633_v14, %v633_v14  ;;  %v64_v27 = vmul.f32 %v643_v20, %v643_v20  ;;  %v653_v28 = vld [vmem:[#allocation2 + $0x70] sm:$0xff]  ;;  %v657_v30 = vld [vmem:[#allocation2 + $0x60] sm:$0xff] }
  0x13   :  { %94 = vadd.xlane.f32.xlu1 %v93_v15  ;;  %v96_v22 = vadd.f32 %v62_v11, %v61_v10  ;;  %v66_v24 = vmul.f32 %v639_v18, %v639_v18  ;;  %v655_v29 = vld [vmem:[#allocation2 + $0x78] sm:$0xff]  ;;  %v659_v31 = vld [vmem:[#allocation2 + $0x68] sm:$0xff]  ;;  %v69_v33 = vmul.f32 %v653_v28, %v653_v28  ;;  %v67_v36 = vmul.f32 %v657_v30, %v657_v30  ;;  %v669_v38 = vld [vmem:[#allocation2 + $0x90] sm:$0xff]  ;;  %p569_p8 = por %p568_p7, %p567_p6 }
  0x14   :  { %88 = vadd.xlane.f32.xlu0 %v87_v21  ;;  %v90_v25 = vadd.f32 %v58_v17, %v57_v16  ;;  %v70_v34 = vmul.f32 %v655_v29, %v655_v29  ;;  %v99_v35 = vadd.f32 %v64_v27, %v63_v26  ;;  %v68_v37 = vmul.f32 %v659_v31, %v659_v31  ;;  %v671_v39 = vld [vmem:[#allocation2 + $0x98] sm:$0xff]  ;;  %v673_v40 = vld [vmem:[#allocation2 + $0x80] sm:$0xff]  ;;  %v675_v41 = vld [vmem:[#allocation2 + $0x88] sm:$0xff] }
  0x15   :  { %v102_v32 = vadd.f32 %v66_v24, %v65_v23  ;;  %v73_v43 = vmul.f32 %v669_v38, %v669_v38  ;;  %v74_v44 = vmul.f32 %v671_v39, %v671_v39  ;;  %v71_v46 = vmul.f32 %v673_v40, %v673_v40  ;;  %v685_v48 = vld [vmem:[#allocation2 + $0xb0] sm:$0xff]  ;;  %v687_v49 = vld [vmem:[#allocation2 + $0xb8] sm:$0xff]  ;;  %v689_v50 = vld [vmem:[#allocation2 + $0xa0] sm:$0xff]  ;;  %p570_p9 = pnand %p569_p8, %p563_p5 }
  0x16   :  { %v108_v42 = vadd.f32 %v70_v34, %v69_v33  ;;  %v105_v45 = vadd.f32 %v68_v37, %v67_v36  ;;  %v72_v47 = vmul.f32 %v675_v41, %v675_v41  ;;  %v691_v51 = vld [vmem:[#allocation2 + $0xa8] sm:$0xff]  ;;  %v77_v53 = vmul.f32 %v685_v48, %v685_v48  ;;  %v701_v58 = vld [vmem:[#allocation2 + $0xd0] sm:$0xff]  ;;  %v703_v59 = vld [vmem:[#allocation2 + $0xd8] sm:$0xff] }
  0x17   :  { %97 = vadd.xlane.f32.xlu1 %v96_v22  ;;  %v114_v52 = vadd.f32 %v74_v44, %v73_v43  ;;  %v78_v54 = vmul.f32 %v687_v49, %v687_v49  ;;  %v75_v56 = vmul.f32 %v689_v50, %v689_v50  ;;  %v76_v57 = vmul.f32 %v691_v51, %v691_v51  ;;  %v705_v60 = vld [vmem:[#allocation2 + $0xc0] sm:$0xff]  ;;  %v707_v61 = vld [vmem:[#allocation2 + $0xc8] sm:$0xff]  ;;  %v717_v10 = vld [vmem:[#allocation2 + $0xf0] sm:$0xff] }
  0x18   :  { %91 = vadd.xlane.f32.xlu0 %v90_v25  ;;  %v111_v55 = vadd.f32 %v72_v47, %v71_v46  ;;  %v81_v63 = vmul.f32 %v701_v58, %v701_v58  ;;  %v82_v3 = vmul.f32 %v703_v59, %v703_v59  ;;  %v79_v6 = vmul.f32 %v705_v60, %v705_v60  ;;  %v719_v11 = vld [vmem:[#allocation2 + $0xf8] sm:$0xff]  ;;  %v721_v15 = vld [vmem:[#allocation2 + $0xe0] sm:$0xff]  ;;  %v723_v16 = vld [vmem:[#allocation2 + $0xe8] sm:$0xff] }
  0x19   :  { %v120_v62 = vadd.f32 %v78_v54, %v77_v53  ;;  %v117_v4 = vadd.f32 %v76_v57, %v75_v56  ;;  %v80_v9 = vmul.f32 %v707_v61, %v707_v61  ;;  %v85_v21 = vmul.f32 %v717_v10, %v717_v10 }
  0x1a   :  { %v126_v17 = vadd.f32 %v82_v3, %v81_v63  ;;  %v86_v22 = vmul.f32 %v719_v11, %v719_v11  ;;  %v83_v24 = vmul.f32 %v721_v15, %v721_v15  ;;  %v84_v25 = vmul.f32 %v723_v16, %v723_v16 }
  0x1b   :  { %103 = vadd.xlane.f32.xlu1 %v102_v32  ;;  %v123_v23 = vadd.f32 %v80_v9, %v79_v6 }
  0x1c   :  { %100 = vadd.xlane.f32.xlu0 %v99_v35  ;;  %v132_v26 = vadd.f32 %v86_v22, %v85_v21  ;;  %v129_v27 = vadd.f32 %v84_v25, %v83_v24 }
  0x1f   :  { %109 = vadd.xlane.f32.xlu1 %v108_v42 }
  0x20   :  { %106 = vadd.xlane.f32.xlu0 %v105_v45 }
  0x23   :  { %115 = vadd.xlane.f32.xlu1 %v114_v52 }
  0x24   :  { %112 = vadd.xlane.f32.xlu0 %v111_v55 }
  0x27   :  { %121 = vadd.xlane.f32.xlu1 %v120_v62 }
  0x28   :  { %118 = vadd.xlane.f32.xlu0 %v117_v4 }
  0x2b   :  { %127 = vadd.xlane.f32.xlu1 %v126_v17 }
  0x2c   :  { %124 = vadd.xlane.f32.xlu0 %v123_v23 }
  0x2f   :  { %133 = vadd.xlane.f32.xlu1 %v132_v26 }
  0x30   :  { %130 = vadd.xlane.f32.xlu0 %v129_v27 }
  0x9c   :  { %v95_v32 = vpop.xlane.xlu1 %94 }
  0x9d   :  { %478 = vrsqrt.f32 %v95_v32  ;;  %v89_v33 = vpop.xlane.xlu0 %88  ;;  %vm151_vm0 = vcmp.eq.f32.partialorder %v95_v32, inf  ;;  %vm153_vm1 = vcmp.eq.f32.partialorder %v95_v32, 0.0  ;;  %v154_v43 = vand.u32 2147483648, %v95_v32 }
  0x9e   :  { %480 = vrsqrt.f32 %v89_v33  ;;  %vm137_vm2 = vcmp.eq.f32.partialorder %v89_v33, inf  ;;  %vm139_vm3 = vcmp.eq.f32.partialorder %v89_v33, 0.0  ;;  %v140_v46 = vand.u32 2147483648, %v89_v33 }
  0xa0   :  { %v98_v34 = vpop.xlane.xlu1 %97 }
  0xa1   :  { %482 = vrsqrt.f32 %v98_v34  ;;  %v92_v35 = vpop.xlane.xlu0 %91  ;;  %vm158_vm4 = vcmp.eq.f32.partialorder %v98_v34, inf  ;;  %vm160_vm5 = vcmp.eq.f32.partialorder %v98_v34, 0.0  ;;  %v161_v53 = vand.u32 2147483648, %v98_v34 }
  0xa2   :  { %484 = vrsqrt.f32 %v92_v35  ;;  %vm144_vm6 = vcmp.eq.f32.partialorder %v92_v35, inf  ;;  %vm146_vm7 = vcmp.eq.f32.partialorder %v92_v35, 0.0  ;;  %v147_v55 = vand.u32 2147483648, %v92_v35 }
  0xa4   :  { %v733_v36 = vpop.xlane.xlu1 %103 }
  0xa5   :  { %486 = vrsqrt.f32 %v733_v36  ;;  %v736_v37 = vpop.xlane.xlu0 %100  ;;  %vm172_vm8 = vcmp.eq.f32.partialorder %v733_v36, inf  ;;  %vm174_vm9 = vcmp.eq.f32.partialorder %v733_v36, 0.0  ;;  %v175_v62 = vand.u32 2147483648, %v733_v36 }
  0xa6   :  { %488 = vrsqrt.f32 %v736_v37  ;;  %vm165_vm10 = vcmp.eq.f32.partialorder %v736_v37, inf  ;;  %vm167_vm11 = vcmp.eq.f32.partialorder %v736_v37, 0.0  ;;  %v168_v25 = vand.u32 2147483648, %v736_v37 }
  0xa8   :  { %v739_v42 = vpop.xlane.xlu1 %109 }
  0xa9   :  { %490 = vrsqrt.f32 %v739_v42  ;;  %v742_v44 = vpop.xlane.xlu0 %106  ;;  %vm186_vm12 = vcmp.eq.f32.partialorder %v739_v42, inf  ;;  %vm188_vm13 = vcmp.eq.f32.partialorder %v739_v42, 0.0 }
  0xaa   :  { %v479_v45 = vpop.eup %478  ;;  %492 = vrsqrt.f32 %v742_v44  ;;  %vm179_vm14 = vcmp.eq.f32.partialorder %v742_v44, inf  ;;  %vm181_vm15 = vcmp.eq.f32.partialorder %v742_v44, 0.0 }
  0xab   :  { %v481_v47 = vpop.eup %480  ;;  %v150_v52 = vmul.f32 %v479_v45, %v95_v32 }
  0xac   :  { %v136_v54 = vmul.f32 %v481_v47, %v89_v33  ;;  %v746_v56 = vpop.xlane.xlu1 %115 }
  0xad   :  { %v152_v57 = vsel %vm151_vm0, %v95_v32, %v150_v52  ;;  %494 = vrsqrt.f32 %v746_v56  ;;  %v752_v63 = vpop.xlane.xlu0 %112  ;;  %v189_v32 = vand.u32 2147483648, %v739_v42  ;;  %vm200_vm0 = vcmp.eq.f32.partialorder %v746_v56, inf }
  0xae   :  { %v483_v3 = vpop.eup %482  ;;  %v155_v4 = vsel %vm153_vm1, %v154_v43, %v152_v57  ;;  %v138_v6 = vsel %vm137_vm2, %v89_v33, %v136_v54  ;;  %496 = vrsqrt.f32 %v752_v63  ;;  %vm202_vm1 = vcmp.eq.f32.partialorder %v746_v56, 0.0 }
  0xaf   :  { %v485_v9 = vpop.eup %484  ;;  %v249_v17 = vmax.f32 %v155_v4, 1e-12  ;;  %v141_v21 = vsel %vm139_vm3, %v140_v46, %v138_v6  ;;  %v157_v22 = vmul.f32 %v483_v3, %v98_v34  ;;  %vm193_vm2 = vcmp.eq.f32.partialorder %v752_v63, inf }
  0xb0   :  { %v247_v23 = vmax.f32 %v141_v21, 1e-12  ;;  %v143_v24 = vmul.f32 %v485_v9, %v92_v35  ;;  %v762_v26 = vpop.xlane.xlu1 %121  ;;  %vm195_vm3 = vcmp.eq.f32.partialorder %v752_v63, 0.0 }
  0xb1   :  { %498 = vrcp.f32 %v249_v17  ;;  %v159_v27 = vsel %vm158_vm4, %v98_v34, %v157_v22  ;;  %v767_v33 = vpop.xlane.xlu0 %118  ;;  %vm214_vm4 = vcmp.eq.f32.partialorder %v762_v26, inf }
  0xb2   :  { %v487_v43 = vpop.eup %486  ;;  %500 = vrcp.f32 %v247_v23  ;;  %v162_v45 = vsel %vm160_vm5, %v161_v53, %v159_v27  ;;  %v145_v46 = vsel %vm144_vm6, %v92_v35, %v143_v24  ;;  %v182_v35 = vand.u32 2147483648, %v742_v44 }
  0xb3   :  { %v489_v47 = vpop.eup %488  ;;  %v250_v52 = vmax.f32 %v162_v45, 1e-12  ;;  %v148_v54 = vsel %vm146_vm7, %v147_v55, %v145_v46  ;;  %v171_v57 = vmul.f32 %v487_v43, %v733_v36  ;;  %502 = vrsqrt.f32 %v762_v26 }
  0xb4   :  { %v248_v3 = vmax.f32 %v148_v54, 1e-12  ;;  %v164_v4 = vmul.f32 %v489_v47, %v736_v37  ;;  %504 = vrsqrt.f32 %v767_v33  ;;  %v778_v34 = vpop.xlane.xlu1 %127  ;;  %vm216_vm5 = vcmp.eq.f32.partialorder %v762_v26, 0.0 }
  0xb5   :  { %506 = vrcp.f32 %v250_v52  ;;  %v173_v53 = vsel %vm172_vm8, %v733_v36, %v171_v57  ;;  %v795_v24 = vpop.xlane.xlu0 %124  ;;  %v217_v52 = vand.u32 2147483648, %v762_v26  ;;  %vm207_vm6 = vcmp.eq.f32.partialorder %v767_v33, inf }
  0xb6   :  { %v491_v55 = vpop.eup %490  ;;  %508 = vrcp.f32 %v248_v3  ;;  %v176_v6 = vsel %vm174_vm9, %v175_v62, %v173_v53  ;;  %v166_v9 = vsel %vm165_vm10, %v736_v37, %v164_v4  ;;  %v203_v62 = vand.u32 2147483648, %v746_v56 }
  0xb7   :  { %v493_v17 = vpop.eup %492  ;;  %v252_v21 = vmax.f32 %v176_v6, 1e-12  ;;  %v169_v22 = vsel %vm167_vm11, %v168_v25, %v166_v9  ;;  %v185_v23 = vmul.f32 %v491_v55, %v739_v42  ;;  %510 = vrsqrt.f32 %v778_v34 }
  0xb8   :  { %v251_v27 = vmax.f32 %v169_v22, 1e-12  ;;  %v178_v36 = vmul.f32 %v493_v17, %v742_v44  ;;  %v196_v37 = vand.u32 2147483648, %v752_v63  ;;  %v805_v25 = vpop.xlane.xlu1 %133  ;;  %vm209_vm7 = vcmp.eq.f32.partialorder %v767_v33, 0.0 }
  0xb9   :  { %512 = vrcp.f32 %v252_v21  ;;  %v187_v43 = vsel %vm186_vm12, %v739_v42, %v185_v23  ;;  %vm228_vm8 = vcmp.eq.f32.partialorder %v778_v34, inf  ;;  %vm230_vm9 = vcmp.eq.f32.partialorder %v778_v34, 0.0 }
  0xba   :  { %v495_v45 = vpop.eup %494  ;;  %514 = vrcp.f32 %v251_v27  ;;  %v190_v46 = vsel %vm188_vm13, %v189_v32, %v187_v43  ;;  %v180_v47 = vsel %vm179_vm14, %v742_v44, %v178_v36  ;;  %v210_v44 = vand.u32 2147483648, %v767_v33 }
  0xbb   :  { %v497_v54 = vpop.eup %496  ;;  %v254_v57 = vmax.f32 %v190_v46, 1e-12  ;;  %v183_v3 = vsel %vm181_vm15, %v182_v35, %v180_v47  ;;  %v199_v4 = vmul.f32 %v495_v45, %v746_v56  ;;  %516 = vrsqrt.f32 %v795_v24  ;;  %v827_v35 = vpop.xlane.xlu0 %130 }
  0xbc   :  { %v253_v42 = vmax.f32 %v183_v3, 1e-12  ;;  %v192_v32 = vmul.f32 %v497_v54, %v752_v63  ;;  %518 = vrsqrt.f32 %v805_v25  ;;  %vm221_vm10 = vcmp.eq.f32.partialorder %v795_v24, inf }
  0xbd   :  { %520 = vrcp.f32 %v254_v57  ;;  %v201_v53 = vsel %vm200_vm0, %v746_v56, %v199_v4  ;;  %vm223_vm11 = vcmp.eq.f32.partialorder %v795_v24, 0.0  ;;  %vm242_vm12 = vcmp.eq.f32.partialorder %v805_v25, inf }
  0xbe   :  { %v499_v55 = vpop.eup %498  ;;  %522 = vrcp.f32 %v253_v42  ;;  %v204_v6 = vsel %vm202_vm1, %v203_v62, %v201_v53  ;;  %v194_v9 = vsel %vm193_vm2, %v752_v63, %v192_v32  ;;  %vm244_vm13 = vcmp.eq.f32.partialorder %v805_v25, 0.0 }
  0xbf   :  { %v501_v17 = vpop.eup %500  ;;  %v283_v21 = vmul.f32 %v499_v55, %v605_v0  ;;  %v284_v22 = vmul.f32 %v499_v55, %v607_v1  ;;  %v256_v23 = vmax.f32 %v204_v6, 1e-12  ;;  %v197_v27 = vsel %vm195_vm3, %v196_v37, %v194_v9 }
  0xc0   :  { %v503_v36 = vpop.eup %502  ;;  %v279_v43 = vmul.f32 %v501_v17, %v609_v2  ;;  %v280_v56 = vmul.f32 %v501_v17, %v615_v5  ;;  %v255_v62 = vmax.f32 %v197_v27, 1e-12  ;;  %524 = vrsqrt.f32 %v827_v35 }
  0xc1   :  { %v505_v45 = vpop.eup %504  ;;  %v458_v46 = vpack.c.bf16 %v284_v22, %v283_v21  ;;  %526 = vrcp.f32 %v256_v23  ;;  %v213_v47 = vmul.f32 %v503_v36, %v762_v26  ;;  %v231_v37 = vand.u32 2147483648, %v778_v34 }
  0xc2   :  { %v507_v0 = vpop.eup %506  ;;  %v456_v1 = vpack.c.bf16 %v280_v56, %v279_v43  ;;  %528 = vrcp.f32 %v255_v62  ;;  %v206_v63 = vmul.f32 %v505_v45, %v767_v33  ;;  %vm235_vm14 = vcmp.eq.f32.partialorder %v827_v35, inf }
  0xc3   :  { %v509_v2 = vpop.eup %508  ;;  %409 = vst [vmem:[#allocation5 + $0x10] sm:$0xff] %v458_v46  ;;  %v285_v5 = vmul.f32 %v507_v0, %v619_v7  ;;  %v286_v54 = vmul.f32 %v507_v0, %v621_v8  ;;  %v215_v57 = vsel %vm214_vm4, %v762_v26, %v213_v47  ;;  %vm237_vm15 = vcmp.eq.f32.partialorder %v827_v35, 0.0 }
  0xc4   :  { %v511_v3 = vpop.eup %510  ;;  %407 = vst [vmem:[#allocation5] sm:$0xff] %v456_v1  ;;  %v281_v4 = vmul.f32 %v509_v2, %v629_v12  ;;  %v282_v42 = vmul.f32 %v509_v2, %v631_v13  ;;  %v218_v32 = vsel %vm216_vm5, %v217_v52, %v215_v57  ;;  %v208_v7 = vsel %vm207_vm6, %v767_v33, %v206_v63 }
  0xc5   :  { %v459_v8 = vpack.c.bf16 %v286_v54, %v285_v5  ;;  %v258_v53 = vmax.f32 %v218_v32, 1e-12  ;;  %v211_v55 = vsel %vm209_vm7, %v210_v44, %v208_v7  ;;  %v227_v6 = vmul.f32 %v511_v3, %v778_v34 }
  0xc6   :  { %v513_v9 = vpop.eup %512  ;;  %v457_v17 = vpack.c.bf16 %v282_v42, %v281_v4  ;;  %v257_v21 = vmax.f32 %v211_v55, 1e-12  ;;  %v224_v12 = vand.u32 2147483648, %v795_v24  ;;  %v238_v42 = vand.u32 2147483648, %v827_v35 }
  0xc7   :  { %v515_v13 = vpop.eup %514  ;;  %410 = vst [vmem:[#allocation5 + $0x18] sm:$0xff] %v459_v8  ;;  %v289_v26 = vmul.f32 %v513_v9, %v633_v14  ;;  %v290_v52 = vmul.f32 %v513_v9, %v639_v18  ;;  %530 = vrcp.f32 %v258_v53  ;;  %v229_v33 = vsel %vm228_vm8, %v778_v34, %v227_v6 }
  0xc8   :  { %v517_v44 = vpop.eup %516  ;;  %408 = vst [vmem:[#allocation5 + $0x8] sm:$0xff] %v457_v17  ;;  %v287_v22 = vmul.f32 %v515_v13, %v641_v19  ;;  %v288_v23 = vmul.f32 %v515_v13, %v643_v20  ;;  %532 = vrcp.f32 %v257_v21  ;;  %v232_v27 = vsel %vm230_vm9, %v231_v37, %v229_v33 }
  0xc9   :  { %v519_v36 = vpop.eup %518  ;;  %v461_v43 = vpack.c.bf16 %v290_v52, %v289_v26  ;;  %v260_v14 = vmax.f32 %v232_v27, 1e-12  ;;  %v220_v18 = vmul.f32 %v517_v44, %v795_v24  ;;  %v245_v19 = vand.u32 2147483648, %v805_v25 }
  0xca   :  { %v521_v56 = vpop.eup %520  ;;  %v460_v62 = vpack.c.bf16 %v288_v23, %v287_v22  ;;  %v241_v45 = vmul.f32 %v519_v36, %v805_v25 }
  0xcb   :  { %v523_v20 = vpop.eup %522  ;;  %412 = vst [vmem:[#allocation5 + $0x28] sm:$0xff] %v461_v43  ;;  %v293_v34 = vmul.f32 %v521_v56, %v653_v28  ;;  %v294_v46 = vmul.f32 %v521_v56, %v655_v29  ;;  %534 = vrcp.f32 %v260_v14  ;;  %v222_v47 = vsel %vm221_vm10, %v795_v24, %v220_v18 }
  0xcc   :  { %411 = vst [vmem:[#allocation5 + $0x20] sm:$0xff] %v460_v62  ;;  %v291_v0 = vmul.f32 %v523_v20, %v657_v30  ;;  %v292_v1 = vmul.f32 %v523_v20, %v659_v31  ;;  %v225_v63 = vsel %vm223_vm11, %v224_v12, %v222_v47  ;;  %v243_v37 = vsel %vm242_vm12, %v805_v25, %v241_v45 }
  0xcd   :  { %v525_v28 = vpop.eup %524  ;;  %v463_v2 = vpack.c.bf16 %v294_v46, %v293_v34  ;;  %v259_v29 = vmax.f32 %v225_v63, 1e-12  ;;  %v246_v5 = vsel %vm244_vm13, %v245_v19, %v243_v37 }
  0xce   :  { %v527_v54 = vpop.eup %526  ;;  %v462_v57 = vpack.c.bf16 %v292_v1, %v291_v0  ;;  %v262_v30 = vmax.f32 %v246_v5, 1e-12  ;;  %v234_v31 = vmul.f32 %v525_v28, %v827_v35 }
  0xcf   :  { %v529_v24 = vpop.eup %528  ;;  %414 = vst [vmem:[#allocation5 + $0x38] sm:$0xff] %v463_v2  ;;  %v297_v3 = vmul.f32 %v527_v54, %v669_v38  ;;  %v298_v4 = vmul.f32 %v527_v54, %v671_v39  ;;  %536 = vrcp.f32 %v259_v29 }
  0xd0   :  { %413 = vst [vmem:[#allocation5 + $0x30] sm:$0xff] %v462_v57  ;;  %v295_v25 = vmul.f32 %v529_v24, %v673_v40  ;;  %v296_v32 = vmul.f32 %v529_v24, %v675_v41  ;;  %538 = vrcp.f32 %v262_v30  ;;  %v236_v7 = vsel %vm235_vm14, %v827_v35, %v234_v31 }
  0xd1   :  { %v465_v8 = vpack.c.bf16 %v298_v4, %v297_v3  ;;  %v239_v53 = vsel %vm237_vm15, %v238_v42, %v236_v7 }
  0xd2   :  { %v464_v55 = vpack.c.bf16 %v296_v32, %v295_v25  ;;  %v261_v6 = vmax.f32 %v239_v53, 1e-12 }
  0xd3   :  { %416 = vst [vmem:[#allocation5 + $0x48] sm:$0xff] %v465_v8 }
  0xd4   :  { %v531_v38 = vpop.eup %530  ;;  %415 = vst [vmem:[#allocation5 + $0x40] sm:$0xff] %v464_v55  ;;  %540 = vrcp.f32 %v261_v6 }
  0xd5   :  { %v533_v39 = vpop.eup %532  ;;  %v301_v9 = vmul.f32 %v531_v38, %v685_v48  ;;  %v302_v40 = vmul.f32 %v531_v38, %v687_v49 }
  0xd6   :  { %v299_v41 = vmul.f32 %v533_v39, %v689_v50  ;;  %v300_v17 = vmul.f32 %v533_v39, %v691_v51 }
  0xd7   :  { %v467_v21 = vpack.c.bf16 %v302_v40, %v301_v9 }
  0xd8   :  { %v535_v12 = vpop.eup %534  ;;  %v466_v35 = vpack.c.bf16 %v300_v17, %v299_v41 }
  0xd9   :  { %418 = vst [vmem:[#allocation5 + $0x58] sm:$0xff] %v467_v21  ;;  %v305_v13 = vmul.f32 %v535_v12, %v701_v58  ;;  %v306_v26 = vmul.f32 %v535_v12, %v703_v59 }
  0xda   :  { %417 = vst [vmem:[#allocation5 + $0x50] sm:$0xff] %v466_v35 }
  0xdb   :  { %v469_v52 = vpack.c.bf16 %v306_v26, %v305_v13 }
  0xdc   :  { %v537_v33 = vpop.eup %536 }
  0xdd   :  { %v539_v44 = vpop.eup %538  ;;  %420 = vst [vmem:[#allocation5 + $0x68] sm:$0xff] %v469_v52  ;;  %v303_v48 = vmul.f32 %v537_v33, %v705_v60  ;;  %v304_v49 = vmul.f32 %v537_v33, %v707_v61 }
  0xde   :  { %v309_v50 = vmul.f32 %v539_v44, %v717_v10  ;;  %v310_v51 = vmul.f32 %v539_v44, %v719_v11 }
  0xdf   :  { %v468_v22 = vpack.c.bf16 %v304_v49, %v303_v48 }
  0xe0   :  { %v471_v23 = vpack.c.bf16 %v310_v51, %v309_v50 }
  0xe1   :  { %v541_v27 = vpop.eup %540  ;;  %419 = vst [vmem:[#allocation5 + $0x60] sm:$0xff] %v468_v22 }
  0xe2   :  { %422 = vst [vmem:[#allocation5 + $0x78] sm:$0xff] %v471_v23  ;;  %v307_v58 = vmul.f32 %v541_v27, %v721_v15  ;;  %v308_v59 = vmul.f32 %v541_v27, %v723_v16 }
  0xe4   :  { %v470_v36 = vpack.c.bf16 %v308_v59, %v307_v58 }
  0xe6   :  { %421 = vst [vmem:[#allocation5 + $0x70] sm:$0xff] %v470_v36 }
  0xe7   :  { %573 = shalt.err (!%p570_p9)
}
  0xe8   :  { %s590_s15 = smov 128   ;;  %s591_s16 = smov 8  }
  0xe9   :  { %434 = dma.vmem_to_hbm [thread:$0]  %s429_s13, 2048, %s919_s1, [#allocation4], %s590_s15, %s590_s15, %s591_s16  }
  0xea   :  { %584 = dma.done.wait [#allocation4], 2048  }
  0xeb   :  { %585 = vsyncadd [#allocation4], 4294965248 }
  0xec   :  { %438 = vsyncpa [#allocation3], 1 }
  0xed   :  { %439 = vsyncpa [#allocation4], 1 }

</bundles_post_ra>
